<compile_context>
chip_gen: v6e
topology: v6e:2x2x1
jax: 0.10.0
libtpu: 0.0.40
codegen_flags: <defaults>
</compile_context>

<pallas_src>
import functools

import jax
import jax.numpy as jnp
from jax.experimental import pallas as pl
from jax.experimental.pallas import tpu as pltpu


def _round_up(n, m):
    return ((n + m - 1) // m) * m


def length_predictor_kernel(x_ref, w1_ref, b1_ref, w2_ref, b2_ref, w3_ref,
                            b3_ref, o_ref):
    """One batch tile of the 3-layer MLP, fused in VMEM, lane-dense layout."""
    xp = x_ref[...].astype(jnp.float32)            # (TB, pack)
    w1 = w1_ref[...].astype(jnp.float32)           # (pack, P) block-diag of (1, dim)
    pack = xp.shape[1]

    # ---- Layer 1: Linear(1, dim) on the VPU (broadcast mul-add, no MXU).
    # Row k of the block-diagonal w1p is nonzero only in its own dim-wide band,
    # so `pack` fused multiply-adds reconstruct the packed Linear(1, dim).
    h = b1_ref[...].astype(jnp.float32)            # (1, P), broadcasts over rows
    for k in range(pack):                          # static, tiny trip count
        h = h + xp[:, k:k + 1] * w1[k:k + 1, :]
    h = h * jax.nn.sigmoid(h)                      # SiLU in f32 (EUP)

    # ---- Layer 2: Linear(dim, dim) on the MXU, f32 accumulation.
    w2 = w2_ref[...]
    h = jnp.dot(h.astype(w2.dtype), w2, preferred_element_type=jnp.float32)
    h = h + b2_ref[...].astype(jnp.float32)
    h = h * jax.nn.sigmoid(h)

    # ---- Layer 3: Linear(dim, dim) on the MXU, f32 accumulation.
    w3 = w3_ref[...]
    h = jnp.dot(h.astype(w3.dtype), w3, preferred_element_type=jnp.float32)
    h = h + b3_ref[...].astype(jnp.float32)

    o_ref[...] = h.astype(o_ref.dtype)             # full-lane (unmasked) store


@functools.partial(jax.jit, static_argnames=("block_rows", "matmul_dtype"))
def length_predictor(x, w1, b1, w2, b2, w3, b3, *, block_rows=None,
                     matmul_dtype=None):
    """x: (B, 1) float32 sentence lengths.  Returns (B, dim) float32."""
    B = x.shape[0]
    dim = w1.shape[1]

    # Lane packing factor: fold `pack` batch rows into the 128-lane axis.
    pack = 128 // dim if (dim < 128 and 128 % dim == 0) else 1
    P = pack * dim

    # Batch tiling (in packed rows). Small batches -> single grid step; large
    # batches -> 512-packed-row tiles (256 KiB activation tile at P=128) so the
    # per-step pipeline overhead is amortised and v7x's 2 TCs get whole tiles.
    rows = -(-B // pack)
    if block_rows is None:
        block_rows = min(512, _round_up(rows, 8))
    block_rows = _round_up(block_rows, 8)
    rows_p = _round_up(rows, block_rows)
    Bp = rows_p * pack
    if Bp != B:
        x = jnp.pad(x, ((0, Bp - B), (0, 0)))      # padded rows sliced off below
    xp = x.reshape(rows_p, pack)                   # free row-major reshape

    # Pack weights so the kernel is lane-dense end to end (all exact zeros in
    # the off-diagonal blocks, so results are bit-compatible with the naive MLP):
    #   w1p[k, k*dim + j]         = w1[0, j]
    #   w2p[k*dim + i, k*dim + j] = w2[i, j]   (block-diagonal), same for w3p
    eye = jnp.eye(pack, dtype=w1.dtype)
    w1p = jnp.kron(eye, w1)                        # (pack, P)
    w2p = jnp.kron(eye, w2)                        # (P, P)
    w3p = jnp.kron(eye, w3)                        # (P, P)
    b1p = jnp.tile(b1, (1, pack))                  # (1, P)
    b2p = jnp.tile(b2, (1, pack))
    b3p = jnp.tile(b3, (1, pack))
    if matmul_dtype is not None:                   # bf16 MXU operands (v6e/v7x)
        w2p = w2p.astype(matmul_dtype)
        w3p = w3p.astype(matmul_dtype)

    grid = (rows_p // block_rows,)
    full = lambda shape: pl.BlockSpec(shape, lambda i: (0, 0))
    # TODO(synk): for very large `dim`, add pipeline_mode=pl.Buffered(1) on the
    # constant weight specs to halve their VMEM residency (v7x: 64 MiB VMEM).

    nbytes = lambda a: a.size * a.dtype.itemsize
    weight_bytes = sum(nbytes(a) for a in (w1p, b1p, w2p, b2p, w3p, b3p))
    cost = pl.CostEstimate(
        flops=int(4 * rows_p * P * P + 2 * rows_p * P * pack + 4 * rows_p * P),
        transcendentals=int(2 * rows_p * P),
        bytes_accessed=int(nbytes(xp) + weight_bytes + rows_p * P * 4),
    )

    cp_kwargs = dict(dimension_semantics=("parallel",))
    vmem_est = 2 * block_rows * (pack + P) * 4 + 2 * weight_bytes \
        + 4 * block_rows * P * 4
    if vmem_est > 16 * 2**20:                      # only when it matters (big dim)
        cp_kwargs["vmem_limit_bytes"] = int(min(vmem_est * 2, 100 * 2**20))

    out_packed = pl.pallas_call(
        length_predictor_kernel,
        out_shape=jax.ShapeDtypeStruct((rows_p, P), x.dtype),
        grid_spec=pltpu.PrefetchScalarGridSpec(
            num_scalar_prefetch=0,
            grid=grid,
            in_specs=[
                pl.BlockSpec((block_rows, pack), lambda i: (i, 0)),   # x tile
                full((pack, P)),                                      # w1p
                full((1, P)),                                         # b1p
                full((P, P)),                                         # w2p
                full((1, P)),                                         # b2p
                full((P, P)),                                         # w3p
                full((1, P)),                                         # b3p
            ],
            out_specs=pl.BlockSpec((block_rows, P), lambda i: (i, 0)),
        ),
        compiler_params=pltpu.CompilerParams(**cp_kwargs),
        cost_estimate=cost,
    )(xp, w1p, b1p, w2p, b2p, w3p, b3p)

    # Undo the lane packing (free row-major reshape) and drop padded rows.
    return out_packed.reshape(Bp, dim)[:B]


def reference_mlp(x, w1, b1, w2, b2, w3, b3, matmul_dtype=None):
    def dot(a, b):
        if matmul_dtype is not None:
            a, b = a.astype(matmul_dtype), b.astype(matmul_dtype)
        return jnp.dot(a, b, preferred_element_type=jnp.float32)

    h = x * w1 + b1                                # Linear(1, dim): K == 1
    h = h * jax.nn.sigmoid(h)
    h = dot(h, w2) + b2
    h = h * jax.nn.sigmoid(h)
    return dot(h, w3) + b3


def _make_params(key, dim):
    k1, k2, k3, kb1, kb2, kb3 = jax.random.split(key, 6)
    w1 = jax.random.normal(k1, (1, dim), jnp.float32)
    b1 = jax.random.normal(kb1, (1, dim), jnp.float32) * 0.1
    w2 = jax.random.normal(k2, (dim, dim), jnp.float32) / jnp.sqrt(dim)
    b2 = jax.random.normal(kb2, (1, dim), jnp.float32) * 0.1
    w3 = jax.random.normal(k3, (dim, dim), jnp.float32) / jnp.sqrt(dim)
    b3 = jax.random.normal(kb3, (1, dim), jnp.float32) * 0.1
    return w1, b1, w2, b2, w3, b3


if __name__ == "__main__":
    key = jax.random.PRNGKey(0)
    k_params, k_params2, k_x, k_x2, k_x3 = jax.random.split(key, 5)

    # ---- Config 1: dim=32 (lane-packed, pack=4), B not a multiple of anything.
    dim = 32
    B = 13
    w1, b1, w2, b2, w3, b3 = _make_params(k_params, dim)
    x = jax.random.uniform(k_x, (B, 1), jnp.float32, minval=0.5, maxval=30.0)

    out = jax.block_until_ready(length_predictor(x, w1, b1, w2, b2, w3, b3))
    ref = reference_mlp(x, w1, b1, w2, b2, w3, b3)
    assert out.shape == (B, dim)
    assert jnp.allclose(out, ref, atol=1e-4, rtol=1e-5), (
        f"f32 max err {jnp.max(jnp.abs(out - ref))}")

    # bf16 MXU operands with f32 accumulation (v6e/v7x fast path).
    out_bf16 = jax.block_until_ready(
        length_predictor(x, w1, b1, w2, b2, w3, b3, matmul_dtype=jnp.bfloat16))
    ref_bf16 = reference_mlp(x, w1, b1, w2, b2, w3, b3,
                             matmul_dtype=jnp.bfloat16)
    assert out_bf16.shape == (B, dim)
    assert jnp.allclose(out_bf16, ref_bf16, atol=1e-2, rtol=1e-2), (
        f"bf16 max err {jnp.max(jnp.abs(out_bf16 - ref_bf16))}")

    # ---- Config 2: larger batch, explicit small tile -> multi-step grid
    #      (exercises the pipelined / "parallel" path and padded tail).
    B2 = 1029
    x2 = jax.random.uniform(k_x2, (B2, 1), jnp.float32, minval=0.5, maxval=30.0)
    out2 = jax.block_until_ready(
        length_predictor(x2, w1, b1, w2, b2, w3, b3, block_rows=64))
    ref2 = reference_mlp(x2, w1, b1, w2, b2, w3, b3)
    assert out2.shape == (B2, dim)
    assert jnp.allclose(out2, ref2, atol=1e-4, rtol=1e-5), (
        f"f32 (tiled) max err {jnp.max(jnp.abs(out2 - ref2))}")

    # ---- Config 3: dim=128 (pack=1, no lane packing) sanity check.
    dim3 = 128
    B3 = 9
    p3 = _make_params(k_params2, dim3)
    x3 = jax.random.uniform(k_x3, (B3, 1), jnp.float32, minval=0.5, maxval=30.0)
    out3 = jax.block_until_ready(length_predictor(x3, *p3))
    ref3 = reference_mlp(x3, *p3)
    assert out3.shape == (B3, dim3)
    assert jnp.allclose(out3, ref3, atol=1e-4, rtol=1e-5), (
        f"f32 (dim=128) max err {jnp.max(jnp.abs(out3 - ref3))}")

    print("KERNEL_OK")
</pallas_src>

<mosaic_0001>
module attributes {stable_mosaic.version = 11 : i64} {
  func.func @length_predictor_kernel(%arg0: i32, %arg1: memref<8x4xf32, #tpu.memory_space<vmem>>, %arg2: memref<4x128xf32, #tpu.memory_space<vmem>>, %arg3: memref<1x128xf32, #tpu.memory_space<vmem>>, %arg4: memref<128x128xf32, #tpu.memory_space<vmem>>, %arg5: memref<1x128xf32, #tpu.memory_space<vmem>>, %arg6: memref<128x128xf32, #tpu.memory_space<vmem>>, %arg7: memref<1x128xf32, #tpu.memory_space<vmem>>, %arg8: memref<8x128xf32, #tpu.memory_space<vmem>>) attributes {dimension_semantics = [#tpu.dimension_semantics<parallel>], iteration_bounds = array<i64: 1>, scalar_prefetch = 0 : i64, scratch_operands = 0 : i64, tpu.core_type = #tpu.core_type<tc>, window_params = [{transform_indices = @transform_0, window_bounds = array<i64: 8, 4>}, {pipeline_mode = #tpu.pipeline_mode<synchronous>, transform_indices = @transform_1, window_bounds = array<i64: 4, 128>}, {pipeline_mode = #tpu.pipeline_mode<synchronous>, transform_indices = @transform_2, window_bounds = array<i64: 1, 128>}, {pipeline_mode = #tpu.pipeline_mode<synchronous>, transform_indices = @transform_3, window_bounds = array<i64: 128, 128>}, {pipeline_mode = #tpu.pipeline_mode<synchronous>, transform_indices = @transform_4, window_bounds = array<i64: 1, 128>}, {pipeline_mode = #tpu.pipeline_mode<synchronous>, transform_indices = @transform_5, window_bounds = array<i64: 128, 128>}, {pipeline_mode = #tpu.pipeline_mode<synchronous>, transform_indices = @transform_6, window_bounds = array<i64: 1, 128>}, {transform_indices = @transform_7, window_bounds = array<i64: 8, 128>}]} {
    %c0 = arith.constant 0 : index
    %c0_0 = arith.constant 0 : index
    %0 = vector.load %arg1[%c0, %c0_0] : memref<8x4xf32, #tpu.memory_space<vmem>>, vector<8x4xf32>
    %c0_1 = arith.constant 0 : index
    %c0_2 = arith.constant 0 : index
    %1 = vector.load %arg2[%c0_1, %c0_2] : memref<4x128xf32, #tpu.memory_space<vmem>>, vector<4x128xf32>
    %c0_3 = arith.constant 0 : index
    %c0_4 = arith.constant 0 : index
    %2 = vector.load %arg3[%c0_3, %c0_4] : memref<1x128xf32, #tpu.memory_space<vmem>>, vector<1x128xf32>
    %3 = vector.extract_strided_slice %0 {offsets = [0, 0], sizes = [8, 1], strides = [1, 1]} : vector<8x4xf32> to vector<8x1xf32>
    %4 = vector.extract_strided_slice %1 {offsets = [0, 0], sizes = [1, 128], strides = [1, 1]} : vector<4x128xf32> to vector<1x128xf32>
    %5 = vector.broadcast %3 : vector<8x1xf32> to vector<8x128xf32>
    %6 = vector.broadcast %4 : vector<1x128xf32> to vector<8x128xf32>
    %7 = arith.mulf %5, %6 : vector<8x128xf32>
    %8 = vector.broadcast %2 : vector<1x128xf32> to vector<8x128xf32>
    %9 = arith.addf %8, %7 : vector<8x128xf32>
    %10 = vector.extract_strided_slice %0 {offsets = [0, 1], sizes = [8, 1], strides = [1, 1]} : vector<8x4xf32> to vector<8x1xf32>
    %11 = vector.extract_strided_slice %1 {offsets = [1, 0], sizes = [1, 128], strides = [1, 1]} : vector<4x128xf32> to vector<1x128xf32>
    %12 = vector.broadcast %10 : vector<8x1xf32> to vector<8x128xf32>
    %13 = vector.broadcast %11 : vector<1x128xf32> to vector<8x128xf32>
    %14 = arith.mulf %12, %13 : vector<8x128xf32>
    %15 = arith.addf %9, %14 : vector<8x128xf32>
    %16 = vector.extract_strided_slice %0 {offsets = [0, 2], sizes = [8, 1], strides = [1, 1]} : vector<8x4xf32> to vector<8x1xf32>
    %17 = vector.extract_strided_slice %1 {offsets = [2, 0], sizes = [1, 128], strides = [1, 1]} : vector<4x128xf32> to vector<1x128xf32>
    %18 = vector.broadcast %16 : vector<8x1xf32> to vector<8x128xf32>
    %19 = vector.broadcast %17 : vector<1x128xf32> to vector<8x128xf32>
    %20 = arith.mulf %18, %19 : vector<8x128xf32>
    %21 = arith.addf %15, %20 : vector<8x128xf32>
    %22 = vector.extract_strided_slice %0 {offsets = [0, 3], sizes = [8, 1], strides = [1, 1]} : vector<8x4xf32> to vector<8x1xf32>
    %23 = vector.extract_strided_slice %1 {offsets = [3, 0], sizes = [1, 128], strides = [1, 1]} : vector<4x128xf32> to vector<1x128xf32>
    %24 = vector.broadcast %22 : vector<8x1xf32> to vector<8x128xf32>
    %25 = vector.broadcast %23 : vector<1x128xf32> to vector<8x128xf32>
    %26 = arith.mulf %24, %25 : vector<8x128xf32>
    %27 = arith.addf %21, %26 : vector<8x128xf32>
    %28 = arith.negf %27 : vector<8x128xf32>
    %29 = math.exp %28 : vector<8x128xf32>
    %cst = arith.constant 1.000000e+00 : f32
    %30 = vector.broadcast %cst : f32 to vector<8x128xf32>
    %31 = arith.addf %30, %29 : vector<8x128xf32>
    %32 = arith.divf %30, %31 : vector<8x128xf32>
    %33 = arith.mulf %27, %32 : vector<8x128xf32>
    %c0_5 = arith.constant 0 : index
    %c0_6 = arith.constant 0 : index
    %34 = vector.load %arg4[%c0_5, %c0_6] : memref<128x128xf32, #tpu.memory_space<vmem>>, vector<128x128xf32>
    %cst_7 = arith.constant dense<0.000000e+00> : vector<8x128xf32>
    %35 = tpu.matmul %33, %34, %cst_7 {dimension_numbers = #tpu.dot_dimension_numbers<[1], [0], [0], [1], [0, 0, 1, 1], [], []>} : vector<8x128xf32>, vector<128x128xf32>, vector<8x128xf32> -> vector<8x128xf32>
    %c0_8 = arith.constant 0 : index
    %c0_9 = arith.constant 0 : index
    %36 = vector.load %arg5[%c0_8, %c0_9] : memref<1x128xf32, #tpu.memory_space<vmem>>, vector<1x128xf32>
    %37 = vector.broadcast %36 : vector<1x128xf32> to vector<8x128xf32>
    %38 = arith.addf %35, %37 : vector<8x128xf32>
    %39 = arith.negf %38 : vector<8x128xf32>
    %40 = math.exp %39 : vector<8x128xf32>
    %cst_10 = arith.constant 1.000000e+00 : f32
    %41 = vector.broadcast %cst_10 : f32 to vector<8x128xf32>
    %42 = arith.addf %41, %40 : vector<8x128xf32>
    %43 = arith.divf %41, %42 : vector<8x128xf32>
    %44 = arith.mulf %38, %43 : vector<8x128xf32>
    %c0_11 = arith.constant 0 : index
    %c0_12 = arith.constant 0 : index
    %45 = vector.load %arg6[%c0_11, %c0_12] : memref<128x128xf32, #tpu.memory_space<vmem>>, vector<128x128xf32>
    %cst_13 = arith.constant dense<0.000000e+00> : vector<8x128xf32>
    %46 = tpu.matmul %44, %45, %cst_13 {dimension_numbers = #tpu.dot_dimension_numbers<[1], [0], [0], [1], [0, 0, 1, 1], [], []>} : vector<8x128xf32>, vector<128x128xf32>, vector<8x128xf32> -> vector<8x128xf32>
    %c0_14 = arith.constant 0 : index
    %c0_15 = arith.constant 0 : index
    %47 = vector.load %arg7[%c0_14, %c0_15] : memref<1x128xf32, #tpu.memory_space<vmem>>, vector<1x128xf32>
    %48 = vector.broadcast %47 : vector<1x128xf32> to vector<8x128xf32>
    %49 = arith.addf %46, %48 : vector<8x128xf32>
    %c0_16 = arith.constant 0 : index
    %c0_17 = arith.constant 0 : index
    %50 = vector.load %arg8[%c0_16, %c0_17] : memref<8x128xf32, #tpu.memory_space<vmem>>, vector<8x128xf32>
    tpu.vector_store %arg8[%c0_16, %c0_17], %49 {strides = array<i32>} : memref<8x128xf32, #tpu.memory_space<vmem>>, vector<8x128xf32>,
    return
  }
  func.func @transform_0(%arg0: i32) -> (i32, i32) {
    %c0_i32 = arith.constant 0 : i32
    %c0_i32_0 = arith.constant 0 : i32
    return %arg0, %c0_i32 : i32, i32
  }
  func.func @transform_1(%arg0: i32) -> (i32, i32) {
    %c0_i32 = arith.constant 0 : i32
    %c0_i32_0 = arith.constant 0 : i32
    %c0_i32_1 = arith.constant 0 : i32
    return %c0_i32, %c0_i32_0 : i32, i32
  }
  func.func @transform_2(%arg0: i32) -> (i32, i32) {
    %c0_i32 = arith.constant 0 : i32
    %c0_i32_0 = arith.constant 0 : i32
    %c0_i32_1 = arith.constant 0 : i32
    return %c0_i32, %c0_i32_0 : i32, i32
  }
  func.func @transform_3(%arg0: i32) -> (i32, i32) {
    %c0_i32 = arith.constant 0 : i32
    %c0_i32_0 = arith.constant 0 : i32
    %c0_i32_1 = arith.constant 0 : i32
    return %c0_i32, %c0_i32_0 : i32, i32
  }
  func.func @transform_4(%arg0: i32) -> (i32, i32) {
    %c0_i32 = arith.constant 0 : i32
    %c0_i32_0 = arith.constant 0 : i32
    %c0_i32_1 = arith.constant 0 : i32
    return %c0_i32, %c0_i32_0 : i32, i32
  }
  func.func @transform_5(%arg0: i32) -> (i32, i32) {
    %c0_i32 = arith.constant 0 : i32
    %c0_i32_0 = arith.constant 0 : i32
    %c0_i32_1 = arith.constant 0 : i32
    return %c0_i32, %c0_i32_0 : i32, i32
  }
  func.func @transform_6(%arg0: i32) -> (i32, i32) {
    %c0_i32 = arith.constant 0 : i32
    %c0_i32_0 = arith.constant 0 : i32
    %c0_i32_1 = arith.constant 0 : i32
    return %c0_i32, %c0_i32_0 : i32, i32
  }
  func.func @transform_7(%arg0: i32) -> (i32, i32) {
    %c0_i32 = arith.constant 0 : i32
    %c0_i32_0 = arith.constant 0 : i32
    return %arg0, %c0_i32 : i32, i32
  }
}

</mosaic_0001>

<bundles_post_ra>
// kernel: length_predictor.1
= control target key start
LH: loop header
LB: loop body
LE: loop exit
PB: predicated region body
PF: predicated region fallthrough
CT: control target
= control target key end

     0   :  { %v409_v0 = vmov 0   ;;  %v410_v2 = vmov 2   ;;  %v411_v3 = vmov 1   ;;  %v412_v4 = vmov 3   ;;  %s603_s0 = inlined_call_operand.vmem [shape: f32[8,4], index: 0, kind: input, shape index: {}]   ;;  %s604_s3 = inlined_call_operand.vmem [shape: f32[128,128], index: 3, kind: input, shape index: {}]   ;;  %s605_s1 = inlined_call_operand.vmem [shape: f32[4,128], index: 1, kind: input, shape index: {}]   ;;  %s606_s2 = inlined_call_operand.vmem [shape: f32[1,128], index: 2, kind: input, shape index: {}]   ;;  %s607_s5 = inlined_call_operand.vmem [shape: f32[128,128], index: 5, kind: input, shape index: {}]   ;;  %s608_s4 = inlined_call_operand.vmem [shape: f32[1,128], index: 4, kind: input, shape index: {}]   ;;  %s609_s6 = inlined_call_operand.vmem [shape: f32[1,128], index: 6, kind: input, shape index: {}]   ;;  %s610_s7 = inlined_call_operand.vmem [shape: f32[8,128], index: 7, kind: output, shape index: {}]  }
   0x1   :  { %396 = vset.pattern.permute.xlu0 %v409_v0  ;;  %v26_v1 = vld [vmem:[%s603_s0] sm:$0xff]  ;;  %398 = vset.pattern.permute.xlu1 %v410_v2  ;;  %v413_v5 = vmov 0.0   ;;  %v98_v6 = vld [vmem:[%s604_s3 + $0x78] sm:$0xff]  ;;  %v97_v7 = vld [vmem:[%s604_s3 + $0x70] sm:$0xff]  ;;  %vm414_vm0 = vmmov 0   ;;  %v34_v22 = vlaneseq }
   0x2   :  { %31 = vperm.xlu0 %396, %v26_v1   ;;  %57 = vperm.xlu1 %398, %v26_v1   ;;  %v96_v8 = vld [vmem:[%s604_s3 + $0x68] sm:$0xff]  ;;  %v95_v9 = vld [vmem:[%s604_s3 + $0x60] sm:$0xff]  ;;  %v94_v10 = vld [vmem:[%s604_s3 + $0x58] sm:$0xff] }
   0x3   :  { %320 = vmatprep.subr.mxu0 %v413_v5  ;;  %355 = vmatprep.subr.mxu1 %v413_v5  ;;  %v93_v11 = vld [vmem:[%s604_s3 + $0x50] sm:$0xff]  ;;  %v92_v12 = vld [vmem:[%s604_s3 + $0x48] sm:$0xff]  ;;  %v91_v13 = vld [vmem:[%s604_s3 + $0x40] sm:$0xff]  ;;  %v35_v23 = vshrl.u32 %v34_v22, 7 }
   0x4   :  { %321 = vmatpush3.msra.mxu0 %v98_v6  ;;  %v90_v14 = vld [vmem:[%s604_s3 + $0x38] sm:$0xff]  ;;  %v89_v15 = vld [vmem:[%s604_s3 + $0x30] sm:$0xff]  ;;  %352 = vmatprep.mubr.msk.f32.mxu0 %vm414_vm0, %v413_v5  ;;  %v88_v16 = vld [vmem:[%s604_s3 + $0x28] sm:$0xff] }
   0x5   :  { %322 = vmatprep.subr.mxu0 %v413_v5  ;;  %387 = vmatprep.mubr.msk.f32.mxu1 %vm414_vm0, %v413_v5  ;;  %v87_v17 = vld [vmem:[%s604_s3 + $0x20] sm:$0xff]  ;;  %v86_v18 = vld [vmem:[%s604_s3 + $0x18] sm:$0xff]  ;;  %v85_v19 = vld [vmem:[%s604_s3 + $0x10] sm:$0xff]  ;;  %v36_v24 = vsub.s32 0, %v35_v23  ;;  %v52_v27 = vsub.s32 1, %v35_v23  ;;  %v62_v29 = vsub.s32 2, %v35_v23 }
   0x6   :  { %397 = vset.pattern.permute.xlu0 %v411_v3  ;;  %399 = vset.pattern.permute.xlu1 %v412_v4  ;;  %v84_v20 = vld [vmem:[%s604_s3 + $0x8] sm:$0xff]  ;;  %v83_v21 = vld [vmem:[%s604_s3] sm:$0xff]  ;;  %v72_v31 = vsub.s32 3, %v35_v23  ;;  %v198_v51 = vld [vmem:[%s607_s5 + $0x78] sm:$0xff] }
   0x7   :  { %47 = vperm.xlu0 %397, %v26_v1   ;;  %67 = vperm.xlu1 %399, %v26_v1   ;;  %v27_v25 = vld [vmem:[%s605_s1] sm:$0xf]  ;;  %v197_v52 = vld [vmem:[%s607_s5 + $0x70] sm:$0xff]  ;;  %v196_v53 = vld [vmem:[%s607_s5 + $0x68] sm:$0xff] }
   0x8   :  { %323 = vmatpush3.msra.mxu0 %v97_v7  ;;  %v37_v26 = vrot.slane %v27_v25, %v36_v24  ;;  %v53_v33 = vrot.slane %v27_v25, %v52_v27  ;;  %v281_v34 = vld [vmem:[%s606_s2] ss:$0 sm:$0xff]  ;;  %v63_v35 = vrot.slane %v27_v25, %v62_v29  ;;  %v73_v36 = vrot.slane %v27_v25, %v72_v31  ;;  %v194_v55 = vld [vmem:[%s607_s5 + $0x58] sm:$0xff]  ;;  %v193_v56 = vld [vmem:[%s607_s5 + $0x50] sm:$0xff] }
   0x9   :  { %324 = vmatprep.subr.mxu0 %v413_v5  ;;  %356 = vmatpush3.msra.mxu1 %v198_v51  ;;  %v195_v54 = vld [vmem:[%s607_s5 + $0x60] sm:$0xff]  ;;  %v192_v57 = vld [vmem:[%s607_s5 + $0x48] sm:$0xff]  ;;  %v190_v59 = vld [vmem:[%s607_s5 + $0x38] sm:$0xff] }
   0xa   :  { %325 = vmatpush3.msra.mxu0 %v96_v8  ;;  %357 = vmatprep.subr.mxu1 %v413_v5  ;;  %v191_v58 = vld [vmem:[%s607_s5 + $0x40] sm:$0xff]  ;;  %v189_v60 = vld [vmem:[%s607_s5 + $0x30] sm:$0xff]  ;;  %v188_v61 = vld [vmem:[%s607_s5 + $0x28] sm:$0xff] }
   0xb   :  { %400 = vset.pattern.permute.xlu0 %v412_v4  ;;  %326 = vmatprep.subr.mxu0 %v413_v5  ;;  %v187_v62 = vld [vmem:[%s607_s5 + $0x20] sm:$0xff]  ;;  %v186_v63 = vld [vmem:[%s607_s5 + $0x18] sm:$0xff]  ;;  %v185_v0 = vld [vmem:[%s607_s5 + $0x10] sm:$0xff] }
   0xc   :  { %327 = vmatpush3.msra.mxu0 %v95_v9  ;;  %358 = vmatpush3.msra.mxu1 %v197_v52  ;;  %v184_v1 = vld [vmem:[%s607_s5 + $0x8] sm:$0xff]  ;;  %v183_v2 = vld [vmem:[%s607_s5] sm:$0xff] }
   0xd   :  { %328 = vmatprep.subr.mxu0 %v413_v5  ;;  %359 = vmatprep.subr.mxu1 %v413_v5  ;;  %v283_v3 = vld [vmem:[%s608_s4] ss:$0 sm:$0xff] }
   0xe   :  { %329 = vmatpush3.msra.mxu0 %v94_v10  ;;  %360 = vmatpush3.msra.mxu1 %v196_v53 }
   0xf   :  { %330 = vmatprep.subr.mxu0 %v413_v5  ;;  %361 = vmatprep.subr.mxu1 %v413_v5 }
  0x10   :  { %331 = vmatpush3.msra.mxu0 %v93_v11  ;;  %362 = vmatpush3.msra.mxu1 %v195_v54 }
  0x11   :  { %332 = vmatprep.subr.mxu0 %v413_v5  ;;  %363 = vmatprep.subr.mxu1 %v413_v5 }
  0x12   :  { %333 = vmatpush3.msra.mxu0 %v92_v12  ;;  %364 = vmatpush3.msra.mxu1 %v194_v55 }
  0x13   :  { %334 = vmatprep.subr.mxu0 %v413_v5  ;;  %365 = vmatprep.subr.mxu1 %v413_v5 }
  0x14   :  { %335 = vmatpush3.msra.mxu0 %v91_v13  ;;  %366 = vmatpush3.msra.mxu1 %v193_v56 }
  0x15   :  { %336 = vmatprep.subr.mxu0 %v413_v5  ;;  %367 = vmatprep.subr.mxu1 %v413_v5 }
  0x16   :  { %337 = vmatpush3.msra.mxu0 %v90_v14  ;;  %368 = vmatpush3.msra.mxu1 %v192_v57 }
  0x17   :  { %338 = vmatprep.subr.mxu0 %v413_v5  ;;  %369 = vmatprep.subr.mxu1 %v413_v5 }
  0x18   :  { %339 = vmatpush3.msra.mxu0 %v89_v15  ;;  %370 = vmatpush3.msra.mxu1 %v191_v58 }
  0x19   :  { %340 = vmatprep.subr.mxu0 %v413_v5  ;;  %371 = vmatprep.subr.mxu1 %v413_v5 }
  0x1a   :  { %341 = vmatpush3.msra.mxu0 %v88_v16  ;;  %372 = vmatpush3.msra.mxu1 %v190_v59 }
  0x1b   :  { %342 = vmatprep.subr.mxu0 %v413_v5  ;;  %373 = vmatprep.subr.mxu1 %v413_v5 }
  0x1c   :  { %343 = vmatpush3.msra.mxu0 %v87_v17  ;;  %374 = vmatpush3.msra.mxu1 %v189_v60 }
  0x1d   :  { %344 = vmatprep.subr.mxu0 %v413_v5  ;;  %375 = vmatprep.subr.mxu1 %v413_v5 }
  0x1e   :  { %345 = vmatpush3.msra.mxu0 %v86_v18  ;;  %376 = vmatpush3.msra.mxu1 %v188_v61 }
  0x1f   :  { %346 = vmatprep.subr.mxu0 %v413_v5  ;;  %377 = vmatprep.subr.mxu1 %v413_v5 }
  0x20   :  { %347 = vmatpush3.msra.mxu0 %v85_v19  ;;  %378 = vmatpush3.msra.mxu1 %v187_v62 }
  0x21   :  { %348 = vmatprep.subr.mxu0 %v413_v5  ;;  %379 = vmatprep.subr.mxu1 %v413_v5 }
  0x22   :  { %349 = vmatpush3.msra.mxu0 %v84_v20  ;;  %380 = vmatpush3.msra.mxu1 %v186_v63 }
  0x23   :  { %350 = vmatprep.subr.mxu0 %v413_v5  ;;  %381 = vmatprep.subr.mxu1 %v413_v5 }
  0x24   :  { %351 = vmatpush3.msra.mxu0 %v83_v21  ;;  %382 = vmatpush3.msra.mxu1 %v185_v0 }
  0x25   :  { %383 = vmatprep.subr.mxu1 %v413_v5 }
  0x26   :  { %384 = vmatpush3.msra.mxu1 %v184_v1 }
  0x27   :  { %385 = vmatprep.subr.mxu1 %v413_v5  ;;  %v285_v5 = vld [vmem:[%s609_s6] ss:$0 sm:$0xff] }
  0x28   :  { %386 = vmatpush3.msra.mxu1 %v183_v2 }
  0x7d   :  { %v32_v28 = vpop.permute.xlu0 %31  ;;  %v58_v30 = vpop.permute.xlu1 %57 }
  0x7e   :  { %v38_v32 = vmul.f32 %v37_v26, %v32_v28  ;;  %v64_v41 = vmul.f32 %v63_v35, %v58_v30 }
  0x80   :  { %v45_v39 = vadd.f32 %v281_v34, %v38_v32 }
  0x82   :  { %v48_v37 = vpop.permute.xlu0 %47  ;;  %v68_v38 = vpop.permute.xlu1 %67 }
  0x83   :  { %v54_v40 = vmul.f32 %v53_v33, %v48_v37  ;;  %v74_v43 = vmul.f32 %v73_v36, %v68_v38 }
  0x85   :  { %v55_v42 = vadd.f32 %v54_v40, %v45_v39 }
  0x87   :  { %v65_v44 = vadd.f32 %v64_v41, %v55_v42 }
  0x89   :  { %v75_v45 = vadd.f32 %v74_v43, %v65_v44 }
  0x8b   :  { %v282_v46 = vmul.f32 -1.442695, %v75_v45 }
  0x8d   :  { %401 = vpow2.f32 %v282_v46 }
  0x9a   :  { %v402_v47 = vpop.eup %401 }
  0x9b   :  { %v79_v48 = vadd.f32 1.0, %v402_v47 }
  0x9d   :  { %403 = vrcp.f32 %v79_v48 }
  0xaa   :  { %v404_v49 = vpop.eup %403 }
  0xab   :  { %v82_v50 = vmul.f32 %v404_v49, %v75_v45 }
  0xad   :  { %353 = vmatmul.mubr.f32.vlgmr.msra.gmra.mxu0 %v82_v50 }
 0x16d   :  { %v172_v4 = vpop.f32.mrf.mxu0 }
 0x16e   :  { %v173_v6 = vadd.f32 %v283_v3, %v172_v4 }
 0x16f   :  { %v354_v7 = vpop.f32.mrf.mxu0 }
 0x170   :  { %v284_v8 = vmul.f32 -1.442695, %v173_v6 }
 0x172   :  { %405 = vpow2.f32 %v284_v8 }
 0x17f   :  { %v406_v9 = vpop.eup %405 }
 0x180   :  { %v179_v10 = vadd.f32 1.0, %v406_v9 }
 0x182   :  { %407 = vrcp.f32 %v179_v10 }
 0x18f   :  { %v408_v11 = vpop.eup %407 }
 0x190   :  { %v182_v12 = vmul.f32 %v408_v11, %v173_v6 }
 0x192   :  { %388 = vmatmul.mubr.f32.vlgmr.msra.gmra.mxu1 %v182_v12 }
 0x252   :  { %v272_v13 = vpop.f32.mrf.mxu1 }
 0x253   :  { %v273_v14 = vadd.f32 %v285_v5, %v272_v13 }
 0x254   :  { %v389_v15 = vpop.f32.mrf.mxu1 }
 0x255   :  { %276 = vst [vmem:[%s610_s7] sm:$0xff] %v273_v14 }

</bundles_post_ra>
